<compile_context>
chip_gen: v7x
topology: tpu7x:2x2x1
jax: 0.10.0
libtpu: 0.0.40
codegen_flags: <defaults>
</compile_context>

<pallas_src>
import functools

import jax
import jax.numpy as jnp
from jax.experimental import pallas as pl
from jax.experimental.pallas import tpu as pltpu


def _round_up(n: int, m: int) -> int:
    return ((n + m - 1) // m) * m


def _cdiv(a: int, b: int) -> int:
    return (a + b - 1) // b


# ---------------------------------------------------------------------------
# Kernels
# ---------------------------------------------------------------------------

def _ffn_kernel_resident(x_ref, w1_ref, b1_ref, w2_ref, b2_ref, o_ref):
    """Weights fully VMEM-resident; grid = (row tiles,). No accumulator."""
    h = jnp.dot(x_ref[...], w1_ref[...], preferred_element_type=jnp.float32)
    h = jnp.maximum(h + b1_ref[...], 0.0)       # bias + ReLU in f32
    # dropout == identity (eval mode)
    y = jnp.dot(h.astype(w2_ref.dtype), w2_ref[...],
                preferred_element_type=jnp.float32)
    o_ref[...] = (y + b2_ref[...]).astype(o_ref.dtype)


def _ffn_kernel_streamed_f32(x_ref, w1_ref, b1_ref, w2_ref, b2_ref, o_ref):
    """d_ff streamed over grid axis 1; f32 output accumulated directly in o_ref."""
    k = pl.program_id(1)

    @pl.when(k == 0)
    def _():
        o_ref[...] = jnp.broadcast_to(b2_ref[...], o_ref.shape)

    h = jnp.dot(x_ref[...], w1_ref[...], preferred_element_type=jnp.float32)
    h = jnp.maximum(h + b1_ref[...], 0.0)
    o_ref[...] += jnp.dot(h.astype(w2_ref.dtype), w2_ref[...],
                          preferred_element_type=jnp.float32)


def _ffn_kernel_streamed_acc(x_ref, w1_ref, b1_ref, w2_ref, b2_ref, o_ref,
                             acc_ref):
    """d_ff streamed; non-f32 output -> separate f32 VMEM accumulator."""
    k = pl.program_id(1)

    @pl.when(k == 0)
    def _():
        acc_ref[...] = jnp.zeros_like(acc_ref)

    h = jnp.dot(x_ref[...], w1_ref[...], preferred_element_type=jnp.float32)
    h = jnp.maximum(h + b1_ref[...], 0.0)
    acc_ref[...] += jnp.dot(h.astype(w2_ref.dtype), w2_ref[...],
                            preferred_element_type=jnp.float32)

    @pl.when(k == pl.num_programs(1) - 1)
    def _():
        o_ref[...] = (acc_ref[...] + b2_ref[...]).astype(o_ref.dtype)


# ---------------------------------------------------------------------------
# Config selection
# ---------------------------------------------------------------------------

@functools.lru_cache(maxsize=1)
def _vmem_limit_bytes() -> int:
    cap = None
    try:
        cap = getattr(pltpu.get_tpu_info(), "vmem_capacity_bytes", None)
    except Exception:
        cap = None
    if not cap:
        cap = 64 * 1024 * 1024   # conservative fallback: v7x per-TC physical
    return max(32 * 1024 * 1024, int(int(cap) * 0.85))


def _select_config(M, d_model, d_ff, x_dtype, w_dtype, vmem_limit,
                   force_streamed):
    d_model_p = _round_up(d_model, 128)
    d_ff_full = _round_up(d_ff, 128)
    x_isz = jnp.dtype(x_dtype).itemsize
    w_isz = jnp.dtype(w_dtype).itemsize
    o_isz = x_isz
    f32_out = jnp.dtype(x_dtype) == jnp.float32
    budget = int(vmem_limit * 0.9)            # headroom for Mosaic scratch

    def row_cost(tm, tf, resident):
        c = 2 * tm * d_model_p * x_isz        # x tile, double-buffered
        c += 2 * tm * d_model_p * o_isz       # out tile, double-buffered
        c += tm * tf * (4 + w_isz)            # f32 h + cast copy for matmul 2
        if (not resident) and (not f32_out):
            c += tm * d_model_p * 4           # f32 accumulator scratch
        return c

    row_cands = (1024, 768, 640, 512, 384, 256, 192, 128, 96, 64, 32, 16, 8)

    w_total = 2 * d_model_p * d_ff_full * w_isz        # one copy of W1 + W2
    resident = (not force_streamed) and (2 * w_total <= int(0.6 * budget))

    if resident:
        tf = d_ff_full
        avail = budget - 2 * w_total          # Pallas double-buffers inputs
    else:
        tf = min(512 if d_model_p < 4096 else 256, d_ff_full)
        while tf > 128 and (budget - 4 * d_model_p * tf * w_isz) < row_cost(
                128, tf, False):
            tf = max(128, (tf // 2) // 128 * 128)
        avail = budget - 4 * d_model_p * tf * w_isz

    tm = 8
    for cand in row_cands:
        if row_cost(cand, tf, resident) <= avail:
            tm = cand
            break
    tm = min(tm, _round_up(M, 8))
    # Megacore guard (v7x has 2 TCs): keep >= 2 blocks on the parallel row axis.
    if M > 8 and M <= tm:
        tm = max(8, _round_up(_cdiv(M, 2), 8))

    d_ff_p = d_ff_full if resident else _round_up(d_ff, tf)
    return resident, tm, tf, d_model_p, d_ff_p


# ---------------------------------------------------------------------------
# Public wrapper
# ---------------------------------------------------------------------------

@functools.partial(jax.jit, static_argnames=("force_streamed",))
def positionwise_ffn(x, w1, b1, w2, b2, *, force_streamed=False):
    """y = relu(x @ w1 + b1) @ w2 + b2 (dropout == identity, eval mode)."""
    B, S, d_model = x.shape
    d_ff = w1.shape[1]
    M = B * S

    vmem_limit = _vmem_limit_bytes()
    resident, tm, tf, d_model_p, d_ff_p = _select_config(
        M, d_model, d_ff, x.dtype, w1.dtype, vmem_limit, force_streamed)
    M_p = _round_up(M, tm)

    x_isz = jnp.dtype(x.dtype).itemsize
    w_isz = jnp.dtype(w1.dtype).itemsize

    # ---- padding (skipped entirely when shapes are already aligned) -------
    x2d = x.reshape(M, d_model)
    if (M_p, d_model_p) != (M, d_model):
        x_p = jnp.zeros((M_p, d_model_p), x.dtype).at[:M, :d_model].set(x2d)
    else:
        x_p = x2d
    if (d_model_p, d_ff_p) != (d_model, d_ff):
        # TODO(synk): in a real model, pad/cast the weights once at init time
        # instead of on every forward call.
        w1_p = jnp.zeros((d_model_p, d_ff_p), w1.dtype).at[:d_model, :d_ff].set(w1)
        w2_p = jnp.zeros((d_ff_p, d_model_p), w2.dtype).at[:d_ff, :d_model].set(w2)
        b1_p = jnp.zeros((1, d_ff_p), jnp.float32).at[0, :d_ff].set(
            b1.astype(jnp.float32))
        b2_p = jnp.zeros((1, d_model_p), jnp.float32).at[0, :d_model].set(
            b2.astype(jnp.float32))
    else:
        w1_p, w2_p = w1, w2
        b1_p = b1.astype(jnp.float32).reshape(1, d_ff_p)
        b2_p = b2.astype(jnp.float32).reshape(1, d_model_p)

    n_row = M_p // tm
    w_reads = 1 if resident else n_row
    flops = 4 * M_p * d_model_p * d_ff_p
    bytes_accessed = (2 * M_p * d_model_p * x_isz                      # x + out
                      + w_reads * 2 * d_model_p * d_ff_p * w_isz       # weights
                      + 4 * (d_ff_p + d_model_p))                      # biases
    cost = pl.CostEstimate(flops=flops, transcendentals=0,
                           bytes_accessed=bytes_accessed)

    if resident:
        grid = (n_row,)
        in_specs = [
            pl.BlockSpec((tm, d_model_p), lambda i: (i, 0)),       # x rows
            pl.BlockSpec((d_model_p, d_ff_p), lambda i: (0, 0)),   # W1 (resident)
            pl.BlockSpec((1, d_ff_p), lambda i: (0, 0)),           # b1
            pl.BlockSpec((d_ff_p, d_model_p), lambda i: (0, 0)),   # W2 (resident)
            pl.BlockSpec((1, d_model_p), lambda i: (0, 0)),        # b2
        ]
        out_spec = pl.BlockSpec((tm, d_model_p), lambda i: (i, 0))
        kernel = _ffn_kernel_resident
        scratch = []
        dims = ("parallel",)
    else:
        grid = (n_row, d_ff_p // tf)
        in_specs = [
            pl.BlockSpec((tm, d_model_p), lambda i, k: (i, 0)),    # x rows
            pl.BlockSpec((d_model_p, tf), lambda i, k: (0, k)),    # W1 cols
            pl.BlockSpec((1, tf), lambda i, k: (0, k)),            # b1 slice
            pl.BlockSpec((tf, d_model_p), lambda i, k: (k, 0)),    # W2 rows
            pl.BlockSpec((1, d_model_p), lambda i, k: (0, 0)),     # b2
        ]
        out_spec = pl.BlockSpec((tm, d_model_p), lambda i, k: (i, 0))
        if jnp.dtype(x.dtype) == jnp.float32:
            kernel = _ffn_kernel_streamed_f32      # accumulate into o_ref
            scratch = []
        else:
            kernel = _ffn_kernel_streamed_acc      # f32 scratch accumulator
            scratch = [pltpu.VMEM((tm, d_model_p), jnp.float32)]
        dims = ("parallel", "arbitrary")

    out_p = pl.pallas_call(
        kernel,
        out_shape=jax.ShapeDtypeStruct((M_p, d_model_p), x.dtype),
        grid_spec=pltpu.PrefetchScalarGridSpec(
            num_scalar_prefetch=0,
            grid=grid,
            in_specs=in_specs,
            out_specs=out_spec,
            scratch_shapes=scratch,
        ),
        compiler_params=pltpu.CompilerParams(
            dimension_semantics=dims,
            vmem_limit_bytes=vmem_limit,
        ),
        cost_estimate=cost,
    )(x_p, w1_p, b1_p, w2_p, b2_p)

    if (M_p, d_model_p) != (M, d_model):
        out_p = out_p[:M, :d_model]
    return out_p.reshape(B, S, d_model)


# ---------------------------------------------------------------------------
# Params / test
# ---------------------------------------------------------------------------

def init_params(key, d_model, d_ff, dtype=jnp.float32):
    # nn.Linear-style uniform(-1/sqrt(fan_in), +1/sqrt(fan_in)) init.
    k1, k2, k3, k4 = jax.random.split(key, 4)
    lim1 = 1.0 / (d_model ** 0.5)
    lim2 = 1.0 / (d_ff ** 0.5)
    w1 = jax.random.uniform(k1, (d_model, d_ff), dtype, -lim1, lim1)
    b1 = jax.random.uniform(k2, (d_ff,), dtype, -lim1, lim1)
    w2 = jax.random.uniform(k3, (d_ff, d_model), dtype, -lim2, lim2)
    b2 = jax.random.uniform(k4, (d_model,), dtype, -lim2, lim2)
    return w1, b1, w2, b2


if __name__ == "__main__":
    key = jax.random.PRNGKey(0)
    kx, kp = jax.random.split(key)

    def ref_ffn(x, w1, b1, w2, b2):
        return jnp.maximum(x @ w1 + b1, 0.0) @ w2 + b2

    # ---- test 1: weight-resident fast path, f32 ---------------------------
    B, S, d_model, d_ff = 2, 8, 32, 128
    x = jax.random.normal(kx, (B, S, d_model), jnp.float32)
    w1, b1, w2, b2 = init_params(kp, d_model, d_ff)
    out = jax.block_until_ready(positionwise_ffn(x, w1, b1, w2, b2))
    ref = ref_ffn(x, w1, b1, w2, b2)
    assert out.shape == (B, S, d_model)
    assert jnp.allclose(out, ref, atol=1e-4, rtol=1e-4), float(
        jnp.max(jnp.abs(out - ref)))

    # ---- test 2: streamed-weight path, f32 output (accumulate into o_ref) -
    d_ff2 = 640   # pads to 1024 with tf=512 -> 2 reduction steps + padding
    w1b, b1b, w2b, b2b = init_params(jax.random.PRNGKey(1), d_model, d_ff2)
    out2 = jax.block_until_ready(
        positionwise_ffn(x, w1b, b1b, w2b, b2b, force_streamed=True))
    ref2 = ref_ffn(x, w1b, b1b, w2b, b2b)
    assert jnp.allclose(out2, ref2, atol=1e-4, rtol=1e-4), float(
        jnp.max(jnp.abs(out2 - ref2)))

    # ---- test 3: streamed-weight path, bf16 (f32 scratch accumulator) -----
    xb = x.astype(jnp.bfloat16)
    w1c, b1c, w2c, b2c = [a.astype(jnp.bfloat16) for a in (w1b, b1b, w2b, b2b)]
    out3 = jax.block_until_ready(
        positionwise_ffn(xb, w1c, b1c, w2c, b2c, force_streamed=True))
    ref3 = ref_ffn(xb.astype(jnp.float32),
                   w1c.astype(jnp.float32), b1c.astype(jnp.float32),
                   w2c.astype(jnp.float32), b2c.astype(jnp.float32))
    assert jnp.allclose(out3.astype(jnp.float32), ref3, atol=5e-2, rtol=5e-2), \
        float(jnp.max(jnp.abs(out3.astype(jnp.float32) - ref3)))

    print("KERNEL_OK")
</pallas_src>

<mosaic_0001>
module attributes {stable_mosaic.version = 11 : i64} {
  func.func @_ffn_kernel_resident(%arg0: i32, %arg1: memref<8x128xf32, #tpu.memory_space<vmem>>, %arg2: memref<128x128xf32, #tpu.memory_space<vmem>>, %arg3: memref<1x128xf32, #tpu.memory_space<vmem>>, %arg4: memref<128x128xf32, #tpu.memory_space<vmem>>, %arg5: memref<1x128xf32, #tpu.memory_space<vmem>>, %arg6: memref<8x128xf32, #tpu.memory_space<vmem>>) attributes {dimension_semantics = [#tpu.dimension_semantics<parallel>], iteration_bounds = array<i64: 2>, scalar_prefetch = 0 : i64, scratch_operands = 0 : i64, tpu.core_type = #tpu.core_type<tc>, window_params = [{transform_indices = @transform_0, window_bounds = array<i64: 8, 128>}, {pipeline_mode = #tpu.pipeline_mode<synchronous>, transform_indices = @transform_1, window_bounds = array<i64: 128, 128>}, {pipeline_mode = #tpu.pipeline_mode<synchronous>, transform_indices = @transform_2, window_bounds = array<i64: 1, 128>}, {pipeline_mode = #tpu.pipeline_mode<synchronous>, transform_indices = @transform_3, window_bounds = array<i64: 128, 128>}, {pipeline_mode = #tpu.pipeline_mode<synchronous>, transform_indices = @transform_4, window_bounds = array<i64: 1, 128>}, {transform_indices = @transform_5, window_bounds = array<i64: 8, 128>}]} {
    %c0 = arith.constant 0 : index
    %c0_0 = arith.constant 0 : index
    %0 = vector.load %arg1[%c0, %c0_0] : memref<8x128xf32, #tpu.memory_space<vmem>>, vector<8x128xf32>
    %c0_1 = arith.constant 0 : index
    %c0_2 = arith.constant 0 : index
    %1 = vector.load %arg2[%c0_1, %c0_2] : memref<128x128xf32, #tpu.memory_space<vmem>>, vector<128x128xf32>
    %cst = arith.constant dense<0.000000e+00> : vector<8x128xf32>
    %2 = tpu.matmul %0, %1, %cst {dimension_numbers = #tpu.dot_dimension_numbers<[1], [0], [0], [1], [0, 0, 1, 1], [], []>} : vector<8x128xf32>, vector<128x128xf32>, vector<8x128xf32> -> vector<8x128xf32>
    %c0_3 = arith.constant 0 : index
    %c0_4 = arith.constant 0 : index
    %3 = vector.load %arg3[%c0_3, %c0_4] : memref<1x128xf32, #tpu.memory_space<vmem>>, vector<1x128xf32>
    %4 = vector.broadcast %3 : vector<1x128xf32> to vector<8x128xf32>
    %5 = arith.addf %2, %4 : vector<8x128xf32>
    %cst_5 = arith.constant 0.000000e+00 : f32
    %6 = vector.broadcast %cst_5 : f32 to vector<8x128xf32>
    %7 = arith.maximumf %5, %6 : vector<8x128xf32>
    %c0_6 = arith.constant 0 : index
    %c0_7 = arith.constant 0 : index
    %8 = vector.load %arg4[%c0_6, %c0_7] : memref<128x128xf32, #tpu.memory_space<vmem>>, vector<128x128xf32>
    %cst_8 = arith.constant dense<0.000000e+00> : vector<8x128xf32>
    %9 = tpu.matmul %7, %8, %cst_8 {dimension_numbers = #tpu.dot_dimension_numbers<[1], [0], [0], [1], [0, 0, 1, 1], [], []>} : vector<8x128xf32>, vector<128x128xf32>, vector<8x128xf32> -> vector<8x128xf32>
    %c0_9 = arith.constant 0 : index
    %c0_10 = arith.constant 0 : index
    %10 = vector.load %arg5[%c0_9, %c0_10] : memref<1x128xf32, #tpu.memory_space<vmem>>, vector<1x128xf32>
    %11 = vector.broadcast %10 : vector<1x128xf32> to vector<8x128xf32>
    %12 = arith.addf %9, %11 : vector<8x128xf32>
    %c0_11 = arith.constant 0 : index
    %c0_12 = arith.constant 0 : index
    %13 = vector.load %arg6[%c0_11, %c0_12] : memref<8x128xf32, #tpu.memory_space<vmem>>, vector<8x128xf32>
    tpu.vector_store %arg6[%c0_11, %c0_12], %12 {strides = array<i32>} : memref<8x128xf32, #tpu.memory_space<vmem>>, vector<8x128xf32>,
    return
  }
  func.func @transform_0(%arg0: i32) -> (i32, i32) {
    %c0_i32 = arith.constant 0 : i32
    %c0_i32_0 = arith.constant 0 : i32
    return %arg0, %c0_i32 : i32, i32
  }
  func.func @transform_1(%arg0: i32) -> (i32, i32) {
    %c0_i32 = arith.constant 0 : i32
    %c0_i32_0 = arith.constant 0 : i32
    %c0_i32_1 = arith.constant 0 : i32
    return %c0_i32, %c0_i32_0 : i32, i32
  }
  func.func @transform_2(%arg0: i32) -> (i32, i32) {
    %c0_i32 = arith.constant 0 : i32
    %c0_i32_0 = arith.constant 0 : i32
    %c0_i32_1 = arith.constant 0 : i32
    return %c0_i32, %c0_i32_0 : i32, i32
  }
  func.func @transform_3(%arg0: i32) -> (i32, i32) {
    %c0_i32 = arith.constant 0 : i32
    %c0_i32_0 = arith.constant 0 : i32
    %c0_i32_1 = arith.constant 0 : i32
    return %c0_i32, %c0_i32_0 : i32, i32
  }
  func.func @transform_4(%arg0: i32) -> (i32, i32) {
    %c0_i32 = arith.constant 0 : i32
    %c0_i32_0 = arith.constant 0 : i32
    %c0_i32_1 = arith.constant 0 : i32
    return %c0_i32, %c0_i32_0 : i32, i32
  }
  func.func @transform_5(%arg0: i32) -> (i32, i32) {
    %c0_i32 = arith.constant 0 : i32
    %c0_i32_0 = arith.constant 0 : i32
    return %arg0, %c0_i32 : i32, i32
  }
}

</mosaic_0001>

<bundles_post_ra>
// kernel: positionwise_ffn.1
= control target key start
LH: loop header
LB: loop body
LE: loop exit
PB: predicated region body
PF: predicated region fallthrough
CT: control target
= control target key end

     0   :  { %s677_s18 = smov 0   ;;  %s819_s0 = inlined_call_operand.vmem [shape: f32[16,128], index: 0, kind: input, shape index: {}]   ;;  %s820_s1 = inlined_call_operand.vmem [shape: f32[128,128], index: 1, kind: input, shape index: {}]   ;;  %s821_s2 = inlined_call_operand.vmem [shape: f32[1,128], index: 2, kind: input, shape index: {}]   ;;  %s822_s3 = inlined_call_operand.vmem [shape: f32[128,128], index: 3, kind: input, shape index: {}]   ;;  %s823_s4 = inlined_call_operand.vmem [shape: f32[1,128], index: 4, kind: input, shape index: {}]   ;;  %s824_s5 = inlined_call_operand.vmem [shape: f32[16,128], index: 5, kind: output, shape index: {}]  }
   0x1 LB: > { %s462_s19 = sadd.s32 4294967295, %s642_s18   ;;  %p466_p0 = scmp.ge.s32.totalorder %s642_s18, 1  ;;  %s642_s18 = sphi %s677_s18, %s15_s18  }
   0x2   : > { %p186_p1 = scmp.lt.s32.totalorder %s642_s18, 3 }
   0x4   : > { %p187_p2 = pnand %p466_p0, %p186_p1 }
   0x5   : > { %v221_v0 = vld [vmem:[%s820_s1] sm:$0xff] (!%p187_p2)  ;;  %v222_v1 = vld [vmem:[%s820_s1 + $0x8] sm:$0xff] (!%p187_p2)  ;;  %v223_v2 = vld [vmem:[%s820_s1 + $0x10] sm:$0xff] (!%p187_p2)  ;;  %v644_v3 = vmov (!%p187_p2), 0.0|0.0   ;;  %vm645_vm0 = vmmov (!%p187_p2), 0   ;;  %v646_v6 = vmov (!%p187_p2), 0.0  }
   0x6   : > { %190 = sbr.rel (%p187_p2) target bundleno = 470 (0x1d6), region = 40  ;;  %577 = vmatprep.subr.bf16.mxu0 (!%p187_p2), %v644_v3  ;;  %v578_v4 = vpack.c.bf16 (!%p187_p2), %v222_v1, %v221_v0  ;;  %v224_v5 = vld [vmem:[%s820_s1 + $0x18] sm:$0xff] (!%p187_p2)  ;;  %539 = vmatprep.mubr.msk.f32.mxu0 (!%p187_p2), %vm645_vm0, %v646_v6  ;;  %v225_v8 = vld [vmem:[%s820_s1 + $0x20] sm:$0xff] (!%p187_p2)  ;;  %v226_v9 = vld [vmem:[%s820_s1 + $0x28] sm:$0xff] (!%p187_p2)  ;;  %p212_p3 = scmp.lt.s32.totalorder (!%p187_p2), %s462_s19, 1 }
   0x7   : > { %601 = vmatprep.subr.bf16.mxu1 (!%p187_p2), %v644_v3  ;;  %574 = vmatprep.mubr.msk.f32.mxu1 (!%p187_p2), %vm645_vm0, %v646_v6  ;;  %v581_v7 = vpack.c.bf16 (!%p187_p2), %v224_v5, %v223_v2  ;;  %v315_v10 = vld [vmem:[%s822_s3] sm:$0xff] (!%p187_p2)  ;;  %v316_v11 = vld [vmem:[%s822_s3 + $0x8] sm:$0xff] (!%p187_p2)  ;;  %v317_v13 = vld [vmem:[%s822_s3 + $0x10] sm:$0xff] (!%p187_p2)  ;;  %v584_v15 = vpack.c.bf16 (!%p187_p2), %v226_v9, %v225_v8 }
   0x8   : > { %579 = vmatpush3.bf16.msra.mxu0 (!%p187_p2), %v578_v4  ;;  %v602_v12 = vpack.c.bf16 (!%p187_p2), %v316_v11, %v315_v10  ;;  %v318_v14 = vld [vmem:[%s822_s3 + $0x18] sm:$0xff] (!%p187_p2)  ;;  %v227_v16 = vld [vmem:[%s820_s1 + $0x30] sm:$0xff] (!%p187_p2)  ;;  %v319_v19 = vld [vmem:[%s822_s3 + $0x20] sm:$0xff] (!%p187_p2) }
   0x9   : > { %580 = vmatprep.subr.bf16.mxu0 (!%p187_p2), %v644_v3  ;;  %v228_v17 = vld [vmem:[%s820_s1 + $0x38] sm:$0xff] (!%p187_p2)  ;;  %v605_v18 = vpack.c.bf16 (!%p187_p2), %v318_v14, %v317_v13  ;;  %v320_v20 = vld [vmem:[%s822_s3 + $0x28] sm:$0xff] (!%p187_p2)  ;;  %v229_v22 = vld [vmem:[%s820_s1 + $0x40] sm:$0xff] (!%p187_p2) }
   0xa   : > { %603 = vmatpush3.bf16.msra.mxu1 (!%p187_p2), %v602_v12  ;;  %v587_v21 = vpack.c.bf16 (!%p187_p2), %v228_v17, %v227_v16  ;;  %v230_v23 = vld [vmem:[%s820_s1 + $0x48] sm:$0xff] (!%p187_p2)  ;;  %v608_v24 = vpack.c.bf16 (!%p187_p2), %v320_v20, %v319_v19  ;;  %v321_v25 = vld [vmem:[%s822_s3 + $0x30] sm:$0xff] (!%p187_p2)  ;;  %v322_v26 = vld [vmem:[%s822_s3 + $0x38] sm:$0xff] (!%p187_p2) }
   0xb   : > { %604 = vmatprep.subr.bf16.mxu1 (!%p187_p2), %v644_v3  ;;  %v590_v27 = vpack.c.bf16 (!%p187_p2), %v230_v23, %v229_v22  ;;  %v231_v28 = vld [vmem:[%s820_s1 + $0x50] sm:$0xff] (!%p187_p2)  ;;  %v232_v29 = vld [vmem:[%s820_s1 + $0x58] sm:$0xff] (!%p187_p2)  ;;  %v611_v30 = vpack.c.bf16 (!%p187_p2), %v322_v26, %v321_v25  ;;  %v323_v31 = vld [vmem:[%s822_s3 + $0x40] sm:$0xff] (!%p187_p2) }
   0xc   : > { %582 = vmatpush3.bf16.msra.mxu0 (!%p187_p2), %v581_v7  ;;  %v324_v32 = vld [vmem:[%s822_s3 + $0x48] sm:$0xff] (!%p187_p2)  ;;  %v593_v33 = vpack.c.bf16 (!%p187_p2), %v232_v29, %v231_v28  ;;  %v233_v34 = vld [vmem:[%s820_s1 + $0x60] sm:$0xff] (!%p187_p2)  ;;  %v325_v37 = vld [vmem:[%s822_s3 + $0x50] sm:$0xff] (!%p187_p2) }
   0xd   : > { %583 = vmatprep.subr.bf16.mxu0 %v644_v3  ;;  %v234_v35 = vld [vmem:[%s820_s1 + $0x68] sm:$0xff]  ;;  %v614_v36 = vpack.c.bf16 %v324_v32, %v323_v31  ;;  %s826_s19 = smov (!%p212_p3, %s462_s19), 1  ;;  %v326_v38 = vld [vmem:[%s822_s3 + $0x58] sm:$0xff]  ;;  %v235_v40 = vld [vmem:[%s820_s1 + $0x70] sm:$0xff] }
   0xe   : > { %606 = vmatpush3.bf16.msra.mxu1 %v605_v18  ;;  %v596_v39 = vpack.c.bf16 %v234_v35, %v233_v34  ;;  %v236_v41 = vld [vmem:[%s820_s1 + $0x78] sm:$0xff]  ;;  %v617_v42 = vpack.c.bf16 %v326_v38, %v325_v37  ;;  %s467_s30 = sshll.u32 %s826_s19, 3  ;;  %v327_v43 = vld [vmem:[%s822_s3 + $0x60] sm:$0xff]  ;;  %v328_v44 = vld [vmem:[%s822_s3 + $0x68] sm:$0xff] }
   0xf   : > { %607 = vmatprep.subr.bf16.mxu1 %v644_v3  ;;  %v599_v45 = vpack.c.bf16 %v236_v41, %v235_v40  ;;  %s215_s12 = scalar_lea.vmem %s819_s0, %s467_s30  ;;  %v620_v46 = vpack.c.bf16 %v328_v44, %v327_v43  ;;  %v329_v48 = vld [vmem:[%s822_s3 + $0x70] sm:$0xff]  ;;  %v330_v49 = vld [vmem:[%s822_s3 + $0x78] sm:$0xff]  ;;  %v469_v51 = vld [vmem:[%s821_s2] ss:$0 sm:$0xff]  ;;  %s219_s24 = scalar_lea.vmem %s824_s5, %s467_s30 }
  0x10   : > { %585 = vmatpush3.bf16.msra.mxu0 %v584_v15  ;;  %v220_v47 = vld [vmem:[%s215_s12] sm:$0xff]  ;;  %v623_v50 = vpack.c.bf16 %v330_v49, %v329_v48 }
  0x11   : > { %586 = vmatprep.subr.bf16.mxu0 %v644_v3  ;;  %v470_v56 = vld [vmem:[%s823_s4] ss:$0 sm:$0xff] }
  0x12   : > { %609 = vmatpush3.bf16.msra.mxu1 %v608_v24 }
  0x13   : > { %610 = vmatprep.subr.bf16.mxu1 %v644_v3 }
  0x14   : > { %588 = vmatpush3.bf16.msra.mxu0 %v587_v21 }
  0x15   : > { %589 = vmatprep.subr.bf16.mxu0 %v644_v3 }
  0x16   : > { %612 = vmatpush3.bf16.msra.mxu1 %v611_v30 }
  0x17   : > { %613 = vmatprep.subr.bf16.mxu1 %v644_v3 }
  0x18   : > { %591 = vmatpush3.bf16.msra.mxu0 %v590_v27 }
  0x19   : > { %592 = vmatprep.subr.bf16.mxu0 %v644_v3 }
  0x1a   : > { %615 = vmatpush3.bf16.msra.mxu1 %v614_v36 }
  0x1b   : > { %616 = vmatprep.subr.bf16.mxu1 %v644_v3 }
  0x1c   : > { %594 = vmatpush3.bf16.msra.mxu0 %v593_v33 }
  0x1d   : > { %595 = vmatprep.subr.bf16.mxu0 %v644_v3 }
  0x1e   : > { %618 = vmatpush3.bf16.msra.mxu1 %v617_v42 }
  0x1f   : > { %619 = vmatprep.subr.bf16.mxu1 %v644_v3 }
  0x20   : > { %597 = vmatpush3.bf16.msra.mxu0 %v596_v39 }
  0x21   : > { %598 = vmatprep.subr.bf16.mxu0 %v644_v3 }
  0x22   : > { %621 = vmatpush3.bf16.msra.mxu1 %v620_v46 }
  0x23   : > { %622 = vmatprep.subr.bf16.mxu1 %v644_v3 }
  0x24   : > { %600 = vmatpush3.bf16.msra.mxu0 %v599_v45 }
  0x26   : > { %624 = vmatpush3.bf16.msra.mxu1 %v623_v50 }
  0x27   : > { %540 = vmatmul.mubr.f32.vlgmr.msra.gmra.mrb[0].mxu0 %v220_v47 }
  0xfa   : > { %v310_v52 = vpop.f32.mrb[0].mxu0 }
  0xfb   : > { %v311_v53 = vadd.f32 %v469_v51, %v310_v52  ;;  %v541_v54 = vpop.f32.mrb[1].mxu0 }
  0xfd   : > { %v314_v55 = vmax.f32 %v311_v53, 0.0 }
  0xff   : > { %575 = vmatmul.mubr.f32.vlgmr.msra.gmra.mrb[0].mxu1 %v314_v55 }
 0x1d2   : > { %v404_v57 = vpop.f32.mrb[0].mxu1 }
 0x1d3   : > { %v405_v58 = vadd.f32 %v470_v56, %v404_v57  ;;  %v576_v59 = vpop.f32.mrb[1].mxu1 }
 0x1d5   : > { %408 = vst [vmem:[%s219_s24] sm:$0xff] %v405_v58 }
 0x1d6 PF: > { %s15_s18 = sadd.s32 1, %s642_s18  }
 0x1d7   : > { %p12_p4 = scmp.ge.s32.totalorder %s15_s18, 4  }
 0x1d9   :  { %14 = sbr.rel (!%p12_p4) target bundleno = 1 (0x1), region = 70 }

</bundles_post_ra>
